<compile_context>
chip_gen: v5e
topology: v5e:2x2
jax: 0.10.0
libtpu: 0.0.40
codegen_flags: <defaults>
</compile_context>

<pallas_src>
import functools

import jax
import jax.numpy as jnp
from jax.experimental import pallas as pl
from jax.experimental.pallas import tpu as pltpu


def _round_up(x, m):
    return ((x + m - 1) // m) * m


def _cdiv(a, b):
    return -(-a // b)


# --------------------------------------------------------------------------- #
# Generation detection and tile defaults
# --------------------------------------------------------------------------- #
@functools.lru_cache(maxsize=1)
def _tpu_config():
    """Returns (vmem_capacity_bytes, tensorcores_per_chip, is_v5e)."""
    vmem = None
    try:
        info = pltpu.get_tpu_info()
        vmem = int(getattr(info, "vmem_capacity_bytes", 0)) or None
    except Exception:
        vmem = None
    kind = ""
    try:
        kind = jax.devices()[0].device_kind.lower()
    except Exception:
        pass
    is_v7 = "v7" in kind
    is_v5e = ("v5e" in kind) or ("v5 lite" in kind) or ("v5lite" in kind)
    if vmem is None:
        vmem = (64 << 20) if is_v7 else (128 << 20)
    num_cores = 2 if is_v7 else 1
    return vmem, num_cores, is_v5e


def _default_tiling():
    """Generation-aware (vmem_budget_bytes, tm_target, num_cores)."""
    vmem, num_cores, is_v5e = _tpu_config()
    # Leave headroom for compiler scratch / semaphores:
    #   128 MiB chips (v5e/v6e) -> ~104 MiB usable, v7x (64 MiB) -> ~40 MiB.
    budget = max(24 << 20, vmem - (24 << 20))
    if is_v5e:
        tm_target = 256          # v5e ridge ~240 FLOP/B: 256 is compute-bound
    elif vmem <= (64 << 20):
        tm_target = 512          # v7x: small VMEM, 2 TCs share the m axis
    else:
        tm_target = 1024         # v6e: ridge ~650-700 FLOP/B
    return budget, tm_target, num_cores


# --------------------------------------------------------------------------- #
# Kernel
# --------------------------------------------------------------------------- #
def gated_mlp_kernel(x_ref, wgu_ref, wd_ref, o_ref, acc_ref):
    """Grid = (m_tiles, ff_tiles); the ff axis (innermost) is a reduction.

    x_ref  : (tm, d_model)          token tile, resident across the ff axis
    wgu_ref: (1, d_model, 2*tff)    fused [gate | up] weight slab for ff tile j
    wd_ref : (1, tff, d_model)      down-proj weight slab for ff tile j
    o_ref  : (tm, d_model)          written once, on the last ff step
    acc_ref: (tm, d_model) f32      scratch accumulator for down-proj partials
    """
    j = pl.program_id(1)
    x = x_ref[...]
    tff = wd_ref.shape[1]

    # Fused gate+up projection: one MXU matmul per ff tile, f32 accumulation.
    gu = jnp.dot(x, wgu_ref[0], preferred_element_type=jnp.float32)  # (tm, 2*tff)
    gate = gu[:, :tff]
    up = gu[:, tff:]
    gated = (up * (gate * jax.nn.sigmoid(gate))).astype(x.dtype)     # SiLU in f32

    partial = jnp.dot(gated, wd_ref[0], preferred_element_type=jnp.float32)

    @pl.when(j == 0)
    def _():
        acc_ref[...] = partial          # init from first partial: no zero + RMW

    @pl.when(j > 0)
    def _():
        acc_ref[...] += partial

    @pl.when(j == pl.num_programs(1) - 1)
    def _():
        o_ref[...] = acc_ref[...].astype(o_ref.dtype)


# --------------------------------------------------------------------------- #
# One-time weight packing (call at parameter-init time, not per forward)
# --------------------------------------------------------------------------- #
def _choose_tff(d_model, d_ff, w_itemsize, x_itemsize, tm, vmem_budget_bytes):
    """Largest ff tile whose double-buffered weight slabs + activation tiles +
    f32 intermediates fit in the VMEM budget."""
    # x / out tiles (double-buffered) + f32 accumulator scratch.
    fixed = 2 * 2 * tm * d_model * x_itemsize + tm * d_model * 4
    chosen = 128
    for cand in (4096, 3072, 2048, 1536, 1024, 768, 512, 384, 256, 128):
        w_bytes = 2 * 3 * d_model * cand * w_itemsize        # [Wg|Wu]+Wd, 2 bufs
        inter_bytes = 3 * tm * (2 * cand) * 4                 # gu + SiLU/gated f32
        if fixed + w_bytes + inter_bytes <= vmem_budget_bytes:
            chosen = cand
            break
    return max(8, min(chosen, d_ff))


def pack_gated_mlp_weights(w_gate, w_up, w_down, *, tff=None, tm=None,
                           vmem_budget_bytes=None, compute_dtype=None):
    """Repack PyTorch nn.Linear-layout weights once (at parameter-init time).

    w_gate, w_up: (d_ff, d_model); w_down: (d_model, d_ff).
    Returns (w_gu, w_d):
        w_gu: (n_ff, d_model, 2*tff)  -- [gate | up] slab per ff tile
        w_d : (n_ff, tff, d_model)    -- down-proj slab per ff tile
    """
    d_ff, d_model = w_gate.shape
    assert w_up.shape == (d_ff, d_model)
    assert w_down.shape == (d_model, d_ff)

    if compute_dtype is not None:
        w_gate = w_gate.astype(compute_dtype)
        w_up = w_up.astype(compute_dtype)
        w_down = w_down.astype(compute_dtype)

    budget, tm_target, _ = _default_tiling()
    if vmem_budget_bytes is None:
        vmem_budget_bytes = budget
    if tm is None:
        tm = tm_target

    itemsize = jnp.dtype(w_gate.dtype).itemsize
    if tff is None:
        tff = _choose_tff(d_model, d_ff, itemsize, itemsize, tm, vmem_budget_bytes)
    n_ff = _cdiv(d_ff, tff)
    d_ff_pad = n_ff * tff

    wg_t = w_gate.T      # (d_model, d_ff)
    wu_t = w_up.T        # (d_model, d_ff)
    wd_t = w_down.T      # (d_ff, d_model)
    if d_ff_pad != d_ff:
        pad = d_ff_pad - d_ff
        # Zero-padded ff columns/rows contribute exactly 0: silu(0) * 0 = 0.
        wg_t = jnp.pad(wg_t, ((0, 0), (0, pad)))
        wu_t = jnp.pad(wu_t, ((0, 0), (0, pad)))
        wd_t = jnp.pad(wd_t, ((0, pad), (0, 0)))

    w_gu = jnp.concatenate(
        [wg_t.reshape(d_model, n_ff, tff), wu_t.reshape(d_model, n_ff, tff)],
        axis=-1,
    ).transpose(1, 0, 2)                      # (n_ff, d_model, 2*tff)
    w_d = wd_t.reshape(n_ff, tff, d_model)    # (n_ff, tff, d_model)
    return w_gu, w_d


# --------------------------------------------------------------------------- #
# Forward pass
# --------------------------------------------------------------------------- #
def _pick_tm(M, tm_target, num_cores):
    tm = min(tm_target, _round_up(M, 8))
    tm = max(8, (tm // 8) * 8)
    # Prefer a tile that divides M exactly (skips the wrapper-side jnp.pad
    # copy of the activations), but never shrink below half the target for it.
    cand = tm
    while cand >= 8 and cand * 2 >= tm:
        if M % cand == 0:
            tm = cand
            break
        cand -= 8
    # v7x megacore: make sure every TensorCore gets at least one m tile.
    while num_cores > 1 and _cdiv(M, tm) < num_cores and tm > 8:
        tm = max(8, ((tm // 2) // 8) * 8)
    return tm


def gated_mlp_forward(x, w_gu, w_d, *, tm=None, vmem_limit_bytes=None):
    """x: (..., d_model); (w_gu, w_d) from pack_gated_mlp_weights()."""
    orig_shape = x.shape
    out_dtype = x.dtype
    d_model = orig_shape[-1]
    n_ff, tff, _ = w_d.shape
    assert w_gu.shape == (n_ff, d_model, 2 * tff)

    # Match the MXU input dtype to the packed weight dtype (e.g. bf16 weights
    # -> bf16 activations); accumulation stays f32 via preferred_element_type.
    if x.dtype != w_gu.dtype:
        x = x.astype(w_gu.dtype)

    vmem_cap, num_cores, _ = _tpu_config()
    _, tm_target, _ = _default_tiling()
    if tm is None:
        tm = tm_target

    x2d = x.reshape(-1, d_model)
    M = x2d.shape[0]
    tm = _pick_tm(M, tm, num_cores)
    M_pad = _round_up(M, tm)
    if M_pad != M:
        # TODO(synk): handle the ragged last m-tile with a masked write instead
        # of this wrapper-side pad (extra HBM copy of the activations).
        x2d = jnp.pad(x2d, ((0, M_pad - M), (0, 0)))   # zero tokens -> zero rows

    if vmem_limit_bytes is None:
        w_isz = jnp.dtype(w_gu.dtype).itemsize
        x_isz = jnp.dtype(x2d.dtype).itemsize
        est = (2 * 2 * tm * d_model * x_isz       # x / out tiles, double-buffered
               + 2 * 3 * d_model * tff * w_isz    # [Wg|Wu] + Wd slabs, 2 buffers
               + tm * d_model * 4                 # f32 accumulator scratch
               + 3 * tm * (2 * tff) * 4)          # gu + SiLU/gated f32 temporaries
        cap = vmem_cap - (8 << 20)                # never declare more than physical
        vmem_limit_bytes = int(max(min(est + (8 << 20), cap), min(32 << 20, cap)))

    out2d = pl.pallas_call(
        gated_mlp_kernel,
        out_shape=jax.ShapeDtypeStruct((M_pad, d_model), out_dtype),
        grid_spec=pltpu.PrefetchScalarGridSpec(
            num_scalar_prefetch=0,
            grid=(M_pad // tm, n_ff),
            in_specs=[
                pl.BlockSpec((tm, d_model), lambda i, j: (i, 0)),             # x tile
                pl.BlockSpec((1, d_model, 2 * tff), lambda i, j: (j, 0, 0)),  # [Wg|Wu]
                pl.BlockSpec((1, tff, d_model), lambda i, j: (j, 0, 0)),      # Wd
            ],
            out_specs=pl.BlockSpec((tm, d_model), lambda i, j: (i, 0)),
            scratch_shapes=[pltpu.VMEM((tm, d_model), jnp.float32)],
        ),
        compiler_params=pltpu.CompilerParams(
            dimension_semantics=("parallel", "arbitrary"),
            vmem_limit_bytes=vmem_limit_bytes,
        ),
    )(x2d, w_gu, w_d)

    if M_pad != M:
        out2d = out2d[:M]
    return out2d.reshape(orig_shape)


def gated_mlp(x, w_gate, w_up, w_down, *, tm=None, tff=None, compute_dtype=None):
    """Convenience wrapper taking PyTorch nn.Linear-layout weights.

    NOTE: packing (transpose + tiling) runs here for convenience; in a real
    model call pack_gated_mlp_weights() once at init and reuse (w_gu, w_d).
    """
    _, tm_target, _ = _default_tiling()
    tm_for_pack = tm if tm is not None else tm_target
    w_gu, w_d = pack_gated_mlp_weights(w_gate, w_up, w_down, tff=tff,
                                       tm=tm_for_pack, compute_dtype=compute_dtype)
    return gated_mlp_forward(x, w_gu, w_d, tm=tm)


# --------------------------------------------------------------------------- #
# Reference + init + test
# --------------------------------------------------------------------------- #
def init_params(key, d_model, d_ff, dtype=jnp.float32):
    """Mimics nn.Linear's U(-1/sqrt(fan_in), +1/sqrt(fan_in)) init."""
    k1, k2, k3 = jax.random.split(key, 3)
    bound_in = 1.0 / (d_model ** 0.5)
    bound_ff = 1.0 / (d_ff ** 0.5)
    w_gate = jax.random.uniform(k1, (d_ff, d_model), dtype, -bound_in, bound_in)
    w_up = jax.random.uniform(k2, (d_ff, d_model), dtype, -bound_in, bound_in)
    w_down = jax.random.uniform(k3, (d_model, d_ff), dtype, -bound_ff, bound_ff)
    return w_gate, w_up, w_down


def gated_mlp_ref(x, w_gate, w_up, w_down):
    """Pure-JAX reference matching the PyTorch forward exactly."""
    gate = jax.nn.silu(x @ w_gate.T)
    up = x @ w_up.T
    return (up * gate) @ w_down.T


if __name__ == "__main__":
    key = jax.random.PRNGKey(0)

    # Test 1: small aligned shapes (single m tile, single ff tile), f32.
    batch, seq, d_model, d_ff = 2, 8, 32, 64
    kx, kp, key = jax.random.split(key, 3)
    x = jax.random.normal(kx, (batch, seq, d_model), jnp.float32)
    w_gate, w_up, w_down = init_params(kp, d_model, d_ff)
    out = jax.block_until_ready(gated_mlp(x, w_gate, w_up, w_down))
    ref = gated_mlp_ref(x, w_gate, w_up, w_down)
    assert out.shape == (batch, seq, d_model)
    assert jnp.allclose(out, ref, atol=1e-5, rtol=1e-5), "test1 mismatch vs reference"

    # Test 2: ragged token count + d_ff tiling/padding (exercises the ff-axis
    # accumulator and the zero-pad paths), f32.
    batch, seq, d_model, d_ff = 3, 5, 32, 96
    kx, kp, key = jax.random.split(key, 3)
    x = jax.random.normal(kx, (batch, seq, d_model), jnp.float32)
    w_gate, w_up, w_down = init_params(kp, d_model, d_ff)
    out = jax.block_until_ready(gated_mlp(x, w_gate, w_up, w_down, tff=64))
    ref = gated_mlp_ref(x, w_gate, w_up, w_down)
    assert out.shape == (batch, seq, d_model)
    assert jnp.allclose(out, ref, atol=1e-5, rtol=1e-5), "test2 mismatch vs reference"

    # Test 3: bf16 compute path (weights packed once in bf16, activations cast
    # at the kernel boundary, f32 accumulation); loose tolerance vs f32 ref.
    kx, kp = jax.random.split(key)
    x = jax.random.normal(kx, (batch, seq, d_model), jnp.float32)
    w_gate, w_up, w_down = init_params(kp, d_model, d_ff)
    out = jax.block_until_ready(
        gated_mlp(x, w_gate, w_up, w_down, tff=64, compute_dtype=jnp.bfloat16))
    ref = gated_mlp_ref(x, w_gate, w_up, w_down)
    assert out.shape == (batch, seq, d_model)
    assert jnp.allclose(out.astype(jnp.float32), ref, atol=5e-2, rtol=5e-2), \
        "test3 (bf16) mismatch vs reference"

    print("KERNEL_OK")
</pallas_src>

<mosaic_0001>
module attributes {stable_mosaic.version = 11 : i64} {
  func.func @gated_mlp_kernel(%arg0: i32, %arg1: i32, %arg2: memref<16x32xf32, #tpu.memory_space<vmem>>, %arg3: memref<1x32x128xf32, #tpu.memory_space<vmem>>, %arg4: memref<1x64x32xf32, #tpu.memory_space<vmem>>, %arg5: memref<16x32xf32, #tpu.memory_space<vmem>>, %arg6: memref<16x32xf32, #tpu.memory_space<vmem>>) attributes {dimension_semantics = [#tpu.dimension_semantics<parallel>, #tpu.dimension_semantics<arbitrary>], iteration_bounds = array<i64: 1, 1>, scalar_prefetch = 0 : i64, scratch_operands = 1 : i64, tpu.core_type = #tpu.core_type<tc>, window_params = [{transform_indices = @transform_0, window_bounds = array<i64: 16, 32>}, {transform_indices = @transform_1, window_bounds = array<i64: 1, 32, 128>}, {transform_indices = @transform_2, window_bounds = array<i64: 1, 64, 32>}, {transform_indices = @transform_3, window_bounds = array<i64: 16, 32>}]} {
    %c0 = arith.constant 0 : index
    %c0_0 = arith.constant 0 : index
    %0 = vector.load %arg2[%c0, %c0_0] : memref<16x32xf32, #tpu.memory_space<vmem>>, vector<16x32xf32>
    %c0_1 = arith.constant 0 : index
    %c0_2 = arith.constant 0 : index
    %c0_3 = arith.constant 0 : index
    %1 = vector.load %arg3[%c0_1, %c0_2, %c0_3] : memref<1x32x128xf32, #tpu.memory_space<vmem>>, vector<1x32x128xf32>
    %2 = vector.shape_cast %1 : vector<1x32x128xf32> to vector<32x128xf32>
    %cst = arith.constant dense<0.000000e+00> : vector<16x128xf32>
    %3 = tpu.matmul %0, %2, %cst {dimension_numbers = #tpu.dot_dimension_numbers<[1], [0], [0], [1], [0, 0, 1, 1], [], []>} : vector<16x32xf32>, vector<32x128xf32>, vector<16x128xf32> -> vector<16x128xf32>
    %4 = vector.extract_strided_slice %3 {offsets = [0, 0], sizes = [16, 64], strides = [1, 1]} : vector<16x128xf32> to vector<16x64xf32>
    %5 = vector.extract_strided_slice %3 {offsets = [0, 64], sizes = [16, 64], strides = [1, 1]} : vector<16x128xf32> to vector<16x64xf32>
    %6 = arith.negf %4 : vector<16x64xf32>
    %7 = math.exp %6 : vector<16x64xf32>
    %cst_4 = arith.constant 1.000000e+00 : f32
    %8 = vector.broadcast %cst_4 : f32 to vector<16x64xf32>
    %9 = arith.addf %8, %7 : vector<16x64xf32>
    %10 = arith.divf %8, %9 : vector<16x64xf32>
    %11 = arith.mulf %4, %10 : vector<16x64xf32>
    %12 = arith.mulf %5, %11 : vector<16x64xf32>
    %c0_5 = arith.constant 0 : index
    %c0_6 = arith.constant 0 : index
    %c0_7 = arith.constant 0 : index
    %13 = vector.load %arg4[%c0_5, %c0_6, %c0_7] : memref<1x64x32xf32, #tpu.memory_space<vmem>>, vector<1x64x32xf32>
    %14 = vector.shape_cast %13 : vector<1x64x32xf32> to vector<64x32xf32>
    %cst_8 = arith.constant dense<0.000000e+00> : vector<16x32xf32>
    %15 = tpu.matmul %12, %14, %cst_8 {dimension_numbers = #tpu.dot_dimension_numbers<[1], [0], [0], [1], [0, 0, 1, 1], [], []>} : vector<16x64xf32>, vector<64x32xf32>, vector<16x32xf32> -> vector<16x32xf32>
    %c0_i32 = arith.constant 0 : i32
    %16 = arith.cmpi eq, %arg1, %c0_i32 : i32
    %17 = arith.extui %16 : i1 to i32
    %c0_i32_9 = arith.constant 0 : i32
    %18 = arith.cmpi ne, %17, %c0_i32_9 : i32
    scf.if %18 {
      %c0_14 = arith.constant 0 : index
      %c0_15 = arith.constant 0 : index
      %25 = vector.load %arg6[%c0_14, %c0_15] : memref<16x32xf32, #tpu.memory_space<vmem>>, vector<16x32xf32>
      tpu.vector_store %arg6[%c0_14, %c0_15], %15 {strides = array<i32>} : memref<16x32xf32, #tpu.memory_space<vmem>>, vector<16x32xf32>,
    } else {
    }
    %c0_i32_10 = arith.constant 0 : i32
    %19 = arith.cmpi sgt, %arg1, %c0_i32_10 : i32
    %20 = arith.extui %19 : i1 to i32
    %c0_i32_11 = arith.constant 0 : i32
    %21 = arith.cmpi ne, %20, %c0_i32_11 : i32
    scf.if %21 {
      %c0_14 = arith.constant 0 : index
      %c0_15 = arith.constant 0 : index
      %25 = vector.load %arg6[%c0_14, %c0_15] : memref<16x32xf32, #tpu.memory_space<vmem>>, vector<16x32xf32>
      %26 = arith.addf %25, %15 : vector<16x32xf32>
      %c0_16 = arith.constant 0 : index
      %c0_17 = arith.constant 0 : index
      %27 = vector.load %arg6[%c0_16, %c0_17] : memref<16x32xf32, #tpu.memory_space<vmem>>, vector<16x32xf32>
      tpu.vector_store %arg6[%c0_16, %c0_17], %26 {strides = array<i32>} : memref<16x32xf32, #tpu.memory_space<vmem>>, vector<16x32xf32>,
    } else {
    }
    %c0_i32_12 = arith.constant 0 : i32
    %22 = arith.cmpi eq, %arg1, %c0_i32_12 : i32
    %23 = arith.extui %22 : i1 to i32
    %c0_i32_13 = arith.constant 0 : i32
    %24 = arith.cmpi ne, %23, %c0_i32_13 : i32
    scf.if %24 {
      %c0_14 = arith.constant 0 : index
      %c0_15 = arith.constant 0 : index
      %25 = vector.load %arg6[%c0_14, %c0_15] : memref<16x32xf32, #tpu.memory_space<vmem>>, vector<16x32xf32>
      %c0_16 = arith.constant 0 : index
      %c0_17 = arith.constant 0 : index
      %26 = vector.load %arg5[%c0_16, %c0_17] : memref<16x32xf32, #tpu.memory_space<vmem>>, vector<16x32xf32>
      tpu.vector_store %arg5[%c0_16, %c0_17], %25 {strides = array<i32>} : memref<16x32xf32, #tpu.memory_space<vmem>>, vector<16x32xf32>,
    } else {
    }
    return
  }
  func.func @transform_0(%arg0: i32, %arg1: i32) -> (i32, i32) {
    %c0_i32 = arith.constant 0 : i32
    %c0_i32_0 = arith.constant 0 : i32
    return %arg0, %c0_i32 : i32, i32
  }
  func.func @transform_1(%arg0: i32, %arg1: i32) -> (i32, i32, i32) {
    %c0_i32 = arith.constant 0 : i32
    %c0_i32_0 = arith.constant 0 : i32
    %c0_i32_1 = arith.constant 0 : i32
    return %arg1, %c0_i32, %c0_i32_0 : i32, i32, i32
  }
  func.func @transform_2(%arg0: i32, %arg1: i32) -> (i32, i32, i32) {
    %c0_i32 = arith.constant 0 : i32
    %c0_i32_0 = arith.constant 0 : i32
    %c0_i32_1 = arith.constant 0 : i32
    return %arg1, %c0_i32, %c0_i32_0 : i32, i32, i32
  }
  func.func @transform_3(%arg0: i32, %arg1: i32) -> (i32, i32) {
    %c0_i32 = arith.constant 0 : i32
    %c0_i32_0 = arith.constant 0 : i32
    return %arg0, %c0_i32 : i32, i32
  }
}

</mosaic_0001>

<bundles_post_ra>
// kernel: tpu_custom_call.1
= control target key start
LH: loop header
LB: loop body
LE: loop exit
PB: predicated region body
PF: predicated region fallthrough
CT: control target
= control target key end

     0   :  { %s329_s0 = inlined_call_operand.vmem [shape: f32[16,32], index: 0, kind: input, shape index: {}]   ;;  %s330_s1 = inlined_call_operand.vmem [shape: f32[1,32,128], index: 1, kind: input, shape index: {}]   ;;  %s331_s2 = inlined_call_operand.vmem [shape: f32[1,64,32], index: 2, kind: input, shape index: {}]   ;;  %s332_s3 = inlined_call_operand.hbm [shape: f32[16,32], index: 3, kind: output, shape index: {}]  }
   0x1   :  { %v20_v0 = vld [vmem:[%s330_s1 + $0x18] sm:$0xff]  ;;  %v19_v1 = vld [vmem:[%s330_s1 + $0x10] sm:$0xff]  ;;  %v18_v2 = vld [vmem:[%s330_s1 + $0x8] sm:$0xff] }
   0x2   :  { %40 = vmatpush.msra.mxu0 %v20_v0  ;;  %190 = vmatpush.msra.mxu3 %v20_v0 }
   0x3   :  { %8 = vsyncpa [#allocation4], 0  ;;  %v17_v3 = vld [vmem:[%s330_s1] sm:$0xff]  ;;  %vm21_vm0 = vcmask 261120   ;;  %v16_v5 = vld [vmem:[%s329_s0 + $0x8] sm:$0xff]  ;;  %vm115_vm9 = vcmask 523264  }
   0x4   :  { %41 = vmatpush.msra.mxu0 %v19_v1  ;;  %191 = vmatpush.msra.mxu3 %v19_v1  ;;  %v15_v4 = vld [vmem:[%s329_s0] sm:$0xff]  ;;  %s240_s0 = smov 64   ;;  %v108_v36 = vld [vmem:[%s331_s2 + $0x38] sm:$0xff]  ;;  %v107_v37 = vld [vmem:[%s331_s2 + $0x30] sm:$0xff]  ;;  %s172_s15 = sshll.u32 %s332_s3, 4  ;;  %s173_s15 = int_to_ptr.hbm [resolvable:$true] %s172_s15 }
   0x5   :  { %194 = vmatpush.msra.mxu2 %v108_v36  ;;  %128 = vmatpush.msra.mxu1 %v108_v36  ;;  %v106_v38 = vld [vmem:[%s331_s2 + $0x28] sm:$0xff]  ;;  %v105_v39 = vld [vmem:[%s331_s2 + $0x20] sm:$0xff]  ;;  %v104_v40 = vld [vmem:[%s331_s2 + $0x18] sm:$0xff]  ;;  %s242_s16 = smov 128   ;;  %s243_s17 = smov 8  }
   0x6   :  { %42 = vmatpush.msra.mxu0 %v18_v2  ;;  %192 = vmatpush.msra.mxu3 %v18_v2  ;;  %v103_v41 = vld [vmem:[%s331_s2 + $0x10] sm:$0xff]  ;;  %v102_v42 = vld [vmem:[%s331_s2 + $0x8] sm:$0xff]  ;;  %v101_v43 = vld [vmem:[%s331_s2] sm:$0xff]  ;;  %s241_s2 = smov [#allocation3]  }
   0x7   :  { %195 = vmatpush.msra.mxu2 %v107_v37  ;;  %129 = vmatpush.msra.mxu1 %v107_v37  ;;  %s170_s12 = sshll.u32 %s241_s2, 4  ;;  %s171_s12 = int_to_ptr.vmem [resolvable:$true] %s170_s12 }
   0x8   :  { %43 = vmatpush.msra.mxu0 %v17_v3  ;;  %193 = vmatpush.msra.mxu3 %v17_v3 }
   0x9   :  { %184 = vmatmul.msk.f32.vlgmr.msra.gmra.mxu0 %vm21_vm0, %v15_v4  ;;  %185 = vmatmul.msk.f32.vlgmr.msra.gmra.mxu3 %vm21_vm0, %v16_v5 }
   0xa   :  { %196 = vmatpush.msra.mxu2 %v106_v38  ;;  %130 = vmatpush.msra.mxu1 %v106_v38 }
   0xc   :  { %197 = vmatpush.msra.mxu2 %v105_v39  ;;  %131 = vmatpush.msra.mxu1 %v105_v39 }
   0xe   :  { %198 = vmatpush.msra.mxu2 %v104_v40  ;;  %132 = vmatpush.msra.mxu1 %v104_v40 }
  0x10   :  { %199 = vmatpush.msra.mxu2 %v103_v41  ;;  %133 = vmatpush.msra.mxu1 %v103_v41 }
  0x12   :  { %200 = vmatpush.msra.mxu2 %v102_v42  ;;  %134 = vmatpush.msra.mxu1 %v102_v42 }
  0x14   :  { %201 = vmatpush.msra.mxu2 %v101_v43  ;;  %135 = vmatpush.msra.mxu1 %v101_v43 }
  0x86   :  { %v284_v6 = vpop.f32.mrf.mxu0 }
  0x87   :  { %v186_v7 = vmul.f32 -1.442695, %v284_v6 }
  0x89   :  { %206 = vpow2.f32 %v186_v7 }
  0x8c   :  { %v287_v8 = vpop.f32.mrf.mxu3 }
  0x8d   :  { %v187_v9 = vmul.f32 -1.442695, %v287_v8 }
  0x8f   :  { %v207_v10 = vpop.eup %206  ;;  %208 = vpow2.f32 %v187_v9 }
  0x90   :  { %v57_v11 = vadd.f32 1.0, %v207_v10 }
  0x92   :  { %210 = vrcp.f32 %v57_v11  ;;  %vm64_vm2 = vweird.f32 %v57_v11  ;;  %v70_v25 = vand.u32 2147483648, %v57_v11  ;;  %v68_v28 = vand.u32 2147483647, %v57_v11 }
  0x94   :  { %v71_v32 = vor.u32 1.1754944e-38, %v70_v25  ;;  %vm69_vm8 = vcmp.eq.f32.partialorder %v68_v28, 8.507059e+37 }
  0x95   :  { %v209_v12 = vpop.eup %208 }
  0x96   :  { %v58_v13 = vadd.f32 1.0, %v209_v12 }
  0x98   :  { %v211_v14 = vpop.eup %210  ;;  %212 = vrcp.f32 %v58_v13  ;;  %v85_v20 = vand.u32 2147483648, %v58_v13  ;;  %v83_v23 = vand.u32 2147483647, %v58_v13  ;;  %vm79_vm4 = vweird.f32 %v58_v13 }
  0x99   :  { %v60_v15 = vmul.f32 %v211_v14, %v57_v11  ;;  %vm65_vm3 = vweird.f32 %v211_v14 }
  0x9a   :  { %v86_v26 = vor.u32 1.1754944e-38, %v85_v20  ;;  %vm84_vm6 = vcmp.eq.f32.partialorder %v83_v23, 8.507059e+37  ;;  %vm66_vm7 = vmor %vm64_vm2, %vm65_vm3 }
  0x9b   :  { %v61_v17 = vsub.f32 1.0, %v60_v15 }
  0x9d   :  { %v62_v21 = vmul.f32 %v211_v14, %v61_v17 }
  0x9e   :  { %v213_v16 = vpop.eup %212 }
  0x9f   :  { %v75_v18 = vmul.f32 %v213_v16, %v58_v13  ;;  %vm80_vm1 = vweird.f32 %v213_v16  ;;  %v63_v27 = vadd.f32 %v211_v14, %v62_v21 }
  0xa0   :  { %vm81_vm5 = vmor %vm79_vm4, %vm80_vm1 }
  0xa1   :  { %v76_v19 = vsub.f32 1.0, %v75_v18  ;;  %v67_v33 = vsel %vm66_vm7, %v211_v14, %v63_v27 }
  0xa2   :  { %v72_v34 = vsel %vm69_vm8, %v71_v32, %v67_v33 }
  0xa3   :  { %v77_v22 = vmul.f32 %v213_v16, %v76_v19  ;;  %v89_v35 = vmul.f32 %v72_v34, %v284_v6 }
  0xa5   :  { %v78_v24 = vadd.f32 %v213_v16, %v77_v22 }
  0xa7   :  { %v82_v29 = vsel %vm81_vm5, %v213_v16, %v78_v24 }
  0xa8   :  { %v87_v30 = vsel %vm84_vm6, %v86_v26, %v82_v29 }
  0xa9   :  { %v90_v31 = vmul.f32 %v87_v30, %v287_v8 }
  0xab   :  { %95 = vrot.lane.b32.xlu0 %v90_v31, %s240_s0 }
  0xb3   :  { %93 = vrot.lane.b32.xlu0 %v89_v35, %s240_s0 }
 0x11d   :  { %v96_v44 = vpop.permute.xlu0 %95 }
 0x11e   :  { %v100_v45 = vmul.f32 %v96_v44, %v287_v8 }
 0x120   :  { %113 = vrot.lane.b32.xlu1 %v100_v45, %s240_s0 }
 0x125   :  { %v94_v46 = vpop.permute.xlu0 %93 }
 0x126   :  { %v99_v47 = vmul.f32 %v94_v46, %v284_v6 }
 0x128   :  { %111 = vrot.lane.b32.xlu1 %v99_v47, %s240_s0 }
 0x192   :  { %v114_v48 = vpop.permute.xlu1 %113 }
 0x193   :  { %189 = vmatmul.msk.f32.vlgmr.msra.gmra.mxu2 %vm115_vm9, %v114_v48 }
 0x19a   :  { %v112_v49 = vpop.permute.xlu1 %111 }
 0x19b   :  { %188 = vmatmul.msk.f32.vlgmr.msra.gmra.mxu1 %vm115_vm9, %v112_v49 }
 0x216   :  { %v140_v50 = vpop.f32.mrf.mxu2 }
 0x217   :  { %148 = vst.msk [vmem:[#allocation2 + $0x8] sm:$0xff] %vm21_vm0, %v140_v50 }
 0x218   :  { %v137_v51 = vpop.f32.mrf.mxu1 }
 0x219   :  { %147 = vst.msk [vmem:[#allocation2] sm:$0xff] %vm21_vm0, %v137_v51 }
 0x21e   :  { %v163_v52 = vld [vmem:[#allocation2 + $0x8] sm:$0xff] }
 0x21f   :  { %165 = vst.msk [vmem:[#allocation3 + $0x8] sm:$0xff] %vm21_vm0, %v163_v52 }
 0x220   :  { %v162_v53 = vld [vmem:[#allocation2] sm:$0xff] }
 0x221   :  { %164 = vst.msk [vmem:[#allocation3] sm:$0xff] %vm21_vm0, %v162_v53 }
 0x222   :  { %178 = dma.vmem_to_hbm [thread:$0]  %s171_s12, 256, %s173_s15, [#allocation4], %s242_s16, %s242_s16, %s243_s17  }
 0x223   :  { %238 = dma.done.wait [#allocation4], 256  }
 0x224   :  { %239 = vsyncadd [#allocation4], 4294967040 }
 0x225   :  { %183 = vsyncpa [#allocation4], 1 }

</bundles_post_ra>
